<compile_context>
chip_gen: v6e
topology: v6e:2x2x1
jax: 0.10.0
libtpu: 0.0.40
codegen_flags: <defaults>
</compile_context>

<pallas_src>
import functools

import jax
import jax.numpy as jnp
from jax.experimental import pallas as pl
from jax.experimental.pallas import tpu as pltpu


_MIB = 1024 * 1024

# Per-generation (per-step streamed-v byte budget, scoped-VMEM limit).
_TILE_BUDGETS = {
    "v7x": (12 * _MIB, 48 * _MIB),   # 64 MiB physical VMEM, 3.2 TB/s HBM
    "v6e": (16 * _MIB, 96 * _MIB),   # 128 MiB physical VMEM
    "v5e": (16 * _MIB, 96 * _MIB),
    "v5p": (16 * _MIB, 96 * _MIB),
    "v4":  (16 * _MIB, 96 * _MIB),
    None:  (8 * _MIB, 32 * _MIB),    # unknown chip: conservative defaults
}


def _tpu_generation():
    try:
        kind = jax.devices()[0].device_kind.lower()
    except Exception:
        return None
    if "v7" in kind or "tpu7" in kind or "7x" in kind:
        return "v7x"
    if "v6" in kind:
        return "v6e"
    if "v5 lite" in kind or "v5e" in kind or "v5litepod" in kind:
        return "v5e"
    if "v5" in kind:
        return "v5p"
    if "v4" in kind:
        return "v4"
    return None


def _masked_pool_kernel(seq_len, tile_s, tiles_per_shard, ragged,
                        mask_ref, *refs):
    # mask_ref : [1, 1, tS] f32   attention-mask tile (wrapper zero-padded)
    # v_refs   : L x [1, tS, H]   per-layer v_proj activation tiles (bf16/f32)
    # out_ref  : [1, 1, L, H] f32 masked seq-sum accumulator (VMEM-resident
    #                             across the S axis, written back per (c, b))
    *v_refs, out_ref = refs
    s = pl.program_id(2)

    @pl.when(s == 0)
    def _init():
        out_ref[...] = jnp.zeros_like(out_ref)

    m = mask_ref[0]                                   # [1, tS] f32

    if ragged:
        # Global sequence-tile index (shard-major); zero rows past the true S
        # explicitly -- do NOT rely on mask==0 (garbage bf16 could be NaN/Inf).
        tile = pl.program_id(0) * tiles_per_shard + s
        row = (jax.lax.broadcasted_iota(jnp.int32, (tile_s, 1), 0)
               + tile * tile_s)
        valid = row < seq_len                         # [tS, 1] bool

    rows = []
    for v_ref in v_refs:
        v = v_ref[0].astype(jnp.float32)              # [tS, H]
        if ragged:
            v = jnp.where(valid, v, 0.0)
        # Masked sum over the sequence tile as an MXU contraction (f32 acc).
        rows.append(jnp.dot(m, v, preferred_element_type=jnp.float32))  # [1,H]

    pooled = rows[0] if len(rows) == 1 else jnp.concatenate(rows, axis=0)
    out_ref[...] += pooled[None, None]                # [1, 1, L, H]


def s_mix_of_layer(v_tensor_groups, attention_mask, rms_weight, gate_weight,
                   gate_bias, temperature=1.0, eps=1e-6,
                   s_shards=None, v_tile_bytes=None, vmem_limit_bytes=None):
    """S_MixOfLayer forward.

    v_tensor_groups: list of L arrays [B, S, H] (the hooked v_proj outputs,
      typically bf16); attention_mask: [B, S].  Returns softmax layer weights
      [B, L] in float32.
    """
    L = len(v_tensor_groups)
    B, S, H = v_tensor_groups[0].shape
    for v in v_tensor_groups:
        assert v.shape == (B, S, H), "all v_proj activations must share a shape"

    gen = _tpu_generation()
    budget, vmem_cap = _TILE_BUDGETS.get(gen, _TILE_BUDGETS[None])
    if v_tile_bytes is not None:
        budget = int(v_tile_bytes)
    if vmem_limit_bytes is not None:
        vmem_cap = int(vmem_limit_bytes)

    # S-tile size from the per-step byte budget over all L streamed tiles.
    itemsize = jnp.dtype(v_tensor_groups[0].dtype).itemsize
    bytes_per_row = max(1, L * H * itemsize)
    tile_cap = max(128, (budget // bytes_per_row) // 128 * 128)

    if S <= tile_cap:
        tile_s, n_tiles = S, 1          # whole sequence in one tile, no padding
    else:
        tile_s = tile_cap               # multiple of 128 (mask lane rule,
        n_tiles = pl.cdiv(S, tile_s)    # bf16 sublane packing)

    # S-shard count (leading "parallel" grid axis).  Gives v7x's second
    # TensorCore work when B == 1; harmless on single-core chips.
    if s_shards is None:
        shards = 2 if (B == 1 and n_tiles >= 2 and n_tiles % 2 == 0) else 1
    else:
        shards = int(s_shards)
        if shards < 1 or n_tiles % shards != 0:
            shards = 1
    tiles_per_shard = n_tiles // shards
    ragged = (n_tiles * tile_s != S)

    # Only the tiny mask is padded; the streamed v tensors are consumed as-is.
    s_pad = n_tiles * tile_s
    mask = attention_mask.astype(jnp.float32)
    if s_pad > S:
        mask = jnp.pad(mask, ((0, 0), (0, s_pad - S)))
    mask = mask.reshape(B, 1, s_pad)

    kernel = functools.partial(_masked_pool_kernel,
                               S, tile_s, tiles_per_shard, ragged)

    mask_spec = pl.BlockSpec((1, 1, tile_s),
                             lambda c, b, s: (b, 0, c * tiles_per_shard + s))
    v_specs = [pl.BlockSpec((1, tile_s, H),
                            lambda c, b, s: (b, c * tiles_per_shard + s, 0))
               for _ in range(L)]

    partial_pooled = pl.pallas_call(
        kernel,
        out_shape=jax.ShapeDtypeStruct((shards, B, L, H), jnp.float32),
        grid_spec=pltpu.PrefetchScalarGridSpec(
            num_scalar_prefetch=0,
            grid=(shards, B, tiles_per_shard),
            in_specs=[mask_spec] + v_specs,
            out_specs=pl.BlockSpec((1, 1, L, H),
                                   lambda c, b, s: (c, b, 0, 0)),
        ),
        compiler_params=pltpu.CompilerParams(
            dimension_semantics=("parallel", "parallel", "arbitrary"),
            vmem_limit_bytes=vmem_cap,
        ),
    )(mask, *v_tensor_groups)

    # Tiny O(B*L*H) epilogue in plain XLA: combine shard partials, RMSNorm,
    # gate Linear, temperature scaling, exact f32 softmax over layers.
    pooled = jnp.sum(partial_pooled, axis=0)                         # [B, L, H]
    var = jnp.mean(pooled * pooled, axis=-1, keepdims=True)
    normed = (pooled * jax.lax.rsqrt(var + eps)
              * rms_weight.astype(jnp.float32)[None, None, :])
    logits = normed @ gate_weight.astype(jnp.float32)[:, None]       # [B, L, 1]
    bias = jnp.asarray(gate_bias, jnp.float32).reshape(-1)[0]
    logits = (logits[..., 0] + bias) / (float(temperature) + 1e-6)
    return jax.nn.softmax(logits, axis=-1)                           # [B, L]


def _reference(v_tensor_groups, attention_mask, rms_weight, gate_weight,
               gate_bias, temperature=1.0, eps=1e-6):
    v = jnp.stack(v_tensor_groups, axis=1).astype(jnp.float32)    # [B, L, S, H]
    m = attention_mask.astype(jnp.float32)
    pooled = jnp.sum(v * m[:, None, :, None], axis=2)             # [B, L, H]
    var = jnp.mean(pooled ** 2, axis=-1, keepdims=True)
    normed = pooled * jax.lax.rsqrt(var + eps) * rms_weight[None, None, :]
    logits = normed @ gate_weight.astype(jnp.float32)[:, None]    # [B, L, 1]
    logits = (logits[..., 0] + gate_bias[0]) / (temperature + 1e-6)
    return jax.nn.softmax(logits, axis=-1)


if __name__ == "__main__":
    key = jax.random.PRNGKey(0)

    def run_case(B, L, S, H, seq_lens, **kw):
        kv, kgw, kgb = jax.random.split(jax.random.fold_in(key, 131 * B + S), 3)
        # Synthetic per-layer v_proj activations (student model runs in bf16).
        v_groups = [
            jax.random.normal(jax.random.fold_in(kv, l), (B, S, H),
                              dtype=jnp.float32).astype(jnp.bfloat16)
            for l in range(L)
        ]
        # Binary attention mask with right padding.
        mask = (jnp.arange(S)[None, :]
                < jnp.asarray(seq_lens)[:, None]).astype(jnp.float32)
        rms_w = jnp.ones((H,), jnp.float32)
        gate_w = jax.random.normal(kgw, (H,), jnp.float32) / jnp.sqrt(H)
        gate_b = jax.random.normal(kgb, (1,), jnp.float32) * 0.01

        out = s_mix_of_layer(v_groups, mask, rms_w, gate_w, gate_b,
                             temperature=1.0, **kw)
        out = jax.block_until_ready(out)

        ref = _reference(v_groups, mask, rms_w, gate_w, gate_b, temperature=1.0)
        assert out.shape == (B, L)
        assert jnp.allclose(out, ref, atol=1e-2, rtol=1e-2)
        assert jnp.allclose(jnp.sum(out, axis=-1), jnp.ones((B,)), atol=1e-5)
        return out

    # Small shapes consistent with the module: B=2, L=8 decoder layers,
    # seq len 8, kv hidden dim 32 (whole-S single tile path).
    run_case(B=2, L=8, S=8, H=32, seq_lens=[8, 5])

    # Exercise the tiled / ragged / S-sharded path: tile_s=128 -> 4 S tiles,
    # ragged last tile (500 rows), 2 "parallel" S shards since B == 1.
    run_case(B=1, L=4, S=500, H=32, seq_lens=[437], v_tile_bytes=32 * 1024)

    print("KERNEL_OK")
</pallas_src>

<mosaic_0001>
module attributes {stable_mosaic.version = 11 : i64} {
  func.func @_masked_pool_kernel(%arg0: i32, %arg1: i32, %arg2: i32, %arg3: memref<1x1x8xf32, #tpu.memory_space<vmem>>, %arg4: memref<1x8x32xbf16, #tpu.memory_space<vmem>>, %arg5: memref<1x8x32xbf16, #tpu.memory_space<vmem>>, %arg6: memref<1x8x32xbf16, #tpu.memory_space<vmem>>, %arg7: memref<1x8x32xbf16, #tpu.memory_space<vmem>>, %arg8: memref<1x8x32xbf16, #tpu.memory_space<vmem>>, %arg9: memref<1x8x32xbf16, #tpu.memory_space<vmem>>, %arg10: memref<1x8x32xbf16, #tpu.memory_space<vmem>>, %arg11: memref<1x8x32xbf16, #tpu.memory_space<vmem>>, %arg12: memref<1x1x8x32xf32, #tpu.memory_space<vmem>>) attributes {dimension_semantics = [#tpu.dimension_semantics<parallel>, #tpu.dimension_semantics<parallel>, #tpu.dimension_semantics<arbitrary>], iteration_bounds = array<i64: 1, 2, 1>, scalar_prefetch = 0 : i64, scratch_operands = 0 : i64, tpu.core_type = #tpu.core_type<tc>, window_params = [{transform_indices = @transform_0, window_bounds = array<i64: 1, 1, 8>}, {transform_indices = @transform_1, window_bounds = array<i64: 1, 8, 32>}, {transform_indices = @transform_2, window_bounds = array<i64: 1, 8, 32>}, {transform_indices = @transform_3, window_bounds = array<i64: 1, 8, 32>}, {transform_indices = @transform_4, window_bounds = array<i64: 1, 8, 32>}, {transform_indices = @transform_5, window_bounds = array<i64: 1, 8, 32>}, {transform_indices = @transform_6, window_bounds = array<i64: 1, 8, 32>}, {transform_indices = @transform_7, window_bounds = array<i64: 1, 8, 32>}, {transform_indices = @transform_8, window_bounds = array<i64: 1, 8, 32>}, {transform_indices = @transform_9, window_bounds = array<i64: 1, 1, 8, 32>}]} {
    %c0_i32 = arith.constant 0 : i32
    %0 = arith.cmpi eq, %arg2, %c0_i32 : i32
    %1 = arith.extui %0 : i1 to i32
    %c0_i32_0 = arith.constant 0 : i32
    %2 = arith.cmpi ne, %1, %c0_i32_0 : i32
    scf.if %2 {
      %cst_42 = arith.constant 0.000000e+00 : f32
      %42 = vector.broadcast %cst_42 : f32 to vector<1x1x8x32xf32>
      %c0_43 = arith.constant 0 : index
      %c0_44 = arith.constant 0 : index
      %c0_45 = arith.constant 0 : index
      %c0_46 = arith.constant 0 : index
      %43 = vector.load %arg12[%c0_43, %c0_44, %c0_45, %c0_46] : memref<1x1x8x32xf32, #tpu.memory_space<vmem>>, vector<1x1x8x32xf32>
      tpu.vector_store %arg12[%c0_43, %c0_44, %c0_45, %c0_46], %42 {strides = array<i32>} : memref<1x1x8x32xf32, #tpu.memory_space<vmem>>, vector<1x1x8x32xf32>,
    } else {
    }
    %c0 = arith.constant 0 : index
    %c0_1 = arith.constant 0 : index
    %c0_2 = arith.constant 0 : index
    %3 = vector.load %arg3[%c0, %c0_1, %c0_2] : memref<1x1x8xf32, #tpu.memory_space<vmem>>, vector<1x1x8xf32>
    %4 = vector.shape_cast %3 : vector<1x1x8xf32> to vector<1x8xf32>
    %c0_3 = arith.constant 0 : index
    %c0_4 = arith.constant 0 : index
    %c0_5 = arith.constant 0 : index
    %5 = vector.load %arg4[%c0_3, %c0_4, %c0_5] : memref<1x8x32xbf16, #tpu.memory_space<vmem>>, vector<1x8x32xbf16>
    %6 = vector.shape_cast %5 : vector<1x8x32xbf16> to vector<8x32xbf16>
    %7 = arith.extf %6 : vector<8x32xbf16> to vector<8x32xf32>
    %cst = arith.constant dense<0.000000e+00> : vector<1x32xf32>
    %8 = tpu.matmul %4, %7, %cst {dimension_numbers = #tpu.dot_dimension_numbers<[1], [0], [0], [1], [0, 0, 1, 1], [], []>} : vector<1x8xf32>, vector<8x32xf32>, vector<1x32xf32> -> vector<1x32xf32>
    %c0_6 = arith.constant 0 : index
    %c0_7 = arith.constant 0 : index
    %c0_8 = arith.constant 0 : index
    %9 = vector.load %arg5[%c0_6, %c0_7, %c0_8] : memref<1x8x32xbf16, #tpu.memory_space<vmem>>, vector<1x8x32xbf16>
    %10 = vector.shape_cast %9 : vector<1x8x32xbf16> to vector<8x32xbf16>
    %11 = arith.extf %10 : vector<8x32xbf16> to vector<8x32xf32>
    %cst_9 = arith.constant dense<0.000000e+00> : vector<1x32xf32>
    %12 = tpu.matmul %4, %11, %cst_9 {dimension_numbers = #tpu.dot_dimension_numbers<[1], [0], [0], [1], [0, 0, 1, 1], [], []>} : vector<1x8xf32>, vector<8x32xf32>, vector<1x32xf32> -> vector<1x32xf32>
    %c0_10 = arith.constant 0 : index
    %c0_11 = arith.constant 0 : index
    %c0_12 = arith.constant 0 : index
    %13 = vector.load %arg6[%c0_10, %c0_11, %c0_12] : memref<1x8x32xbf16, #tpu.memory_space<vmem>>, vector<1x8x32xbf16>
    %14 = vector.shape_cast %13 : vector<1x8x32xbf16> to vector<8x32xbf16>
    %15 = arith.extf %14 : vector<8x32xbf16> to vector<8x32xf32>
    %cst_13 = arith.constant dense<0.000000e+00> : vector<1x32xf32>
    %16 = tpu.matmul %4, %15, %cst_13 {dimension_numbers = #tpu.dot_dimension_numbers<[1], [0], [0], [1], [0, 0, 1, 1], [], []>} : vector<1x8xf32>, vector<8x32xf32>, vector<1x32xf32> -> vector<1x32xf32>
    %c0_14 = arith.constant 0 : index
    %c0_15 = arith.constant 0 : index
    %c0_16 = arith.constant 0 : index
    %17 = vector.load %arg7[%c0_14, %c0_15, %c0_16] : memref<1x8x32xbf16, #tpu.memory_space<vmem>>, vector<1x8x32xbf16>
    %18 = vector.shape_cast %17 : vector<1x8x32xbf16> to vector<8x32xbf16>
    %19 = arith.extf %18 : vector<8x32xbf16> to vector<8x32xf32>
    %cst_17 = arith.constant dense<0.000000e+00> : vector<1x32xf32>
    %20 = tpu.matmul %4, %19, %cst_17 {dimension_numbers = #tpu.dot_dimension_numbers<[1], [0], [0], [1], [0, 0, 1, 1], [], []>} : vector<1x8xf32>, vector<8x32xf32>, vector<1x32xf32> -> vector<1x32xf32>
    %c0_18 = arith.constant 0 : index
    %c0_19 = arith.constant 0 : index
    %c0_20 = arith.constant 0 : index
    %21 = vector.load %arg8[%c0_18, %c0_19, %c0_20] : memref<1x8x32xbf16, #tpu.memory_space<vmem>>, vector<1x8x32xbf16>
    %22 = vector.shape_cast %21 : vector<1x8x32xbf16> to vector<8x32xbf16>
    %23 = arith.extf %22 : vector<8x32xbf16> to vector<8x32xf32>
    %cst_21 = arith.constant dense<0.000000e+00> : vector<1x32xf32>
    %24 = tpu.matmul %4, %23, %cst_21 {dimension_numbers = #tpu.dot_dimension_numbers<[1], [0], [0], [1], [0, 0, 1, 1], [], []>} : vector<1x8xf32>, vector<8x32xf32>, vector<1x32xf32> -> vector<1x32xf32>
    %c0_22 = arith.constant 0 : index
    %c0_23 = arith.constant 0 : index
    %c0_24 = arith.constant 0 : index
    %25 = vector.load %arg9[%c0_22, %c0_23, %c0_24] : memref<1x8x32xbf16, #tpu.memory_space<vmem>>, vector<1x8x32xbf16>
    %26 = vector.shape_cast %25 : vector<1x8x32xbf16> to vector<8x32xbf16>
    %27 = arith.extf %26 : vector<8x32xbf16> to vector<8x32xf32>
    %cst_25 = arith.constant dense<0.000000e+00> : vector<1x32xf32>
    %28 = tpu.matmul %4, %27, %cst_25 {dimension_numbers = #tpu.dot_dimension_numbers<[1], [0], [0], [1], [0, 0, 1, 1], [], []>} : vector<1x8xf32>, vector<8x32xf32>, vector<1x32xf32> -> vector<1x32xf32>
    %c0_26 = arith.constant 0 : index
    %c0_27 = arith.constant 0 : index
    %c0_28 = arith.constant 0 : index
    %29 = vector.load %arg10[%c0_26, %c0_27, %c0_28] : memref<1x8x32xbf16, #tpu.memory_space<vmem>>, vector<1x8x32xbf16>
    %30 = vector.shape_cast %29 : vector<1x8x32xbf16> to vector<8x32xbf16>
    %31 = arith.extf %30 : vector<8x32xbf16> to vector<8x32xf32>
    %cst_29 = arith.constant dense<0.000000e+00> : vector<1x32xf32>
    %32 = tpu.matmul %4, %31, %cst_29 {dimension_numbers = #tpu.dot_dimension_numbers<[1], [0], [0], [1], [0, 0, 1, 1], [], []>} : vector<1x8xf32>, vector<8x32xf32>, vector<1x32xf32> -> vector<1x32xf32>
    %c0_30 = arith.constant 0 : index
    %c0_31 = arith.constant 0 : index
    %c0_32 = arith.constant 0 : index
    %33 = vector.load %arg11[%c0_30, %c0_31, %c0_32] : memref<1x8x32xbf16, #tpu.memory_space<vmem>>, vector<1x8x32xbf16>
    %34 = vector.shape_cast %33 : vector<1x8x32xbf16> to vector<8x32xbf16>
    %35 = arith.extf %34 : vector<8x32xbf16> to vector<8x32xf32>
    %cst_33 = arith.constant dense<0.000000e+00> : vector<1x32xf32>
    %36 = tpu.matmul %4, %35, %cst_33 {dimension_numbers = #tpu.dot_dimension_numbers<[1], [0], [0], [1], [0, 0, 1, 1], [], []>} : vector<1x8xf32>, vector<8x32xf32>, vector<1x32xf32> -> vector<1x32xf32>
    %37 = tpu.concatenate %8, %12, %16, %20, %24, %28, %32, %36 in 0 : vector<1x32xf32>, vector<1x32xf32>, vector<1x32xf32>, vector<1x32xf32>, vector<1x32xf32>, vector<1x32xf32>, vector<1x32xf32>, vector<1x32xf32> -> vector<8x32xf32>
    %c0_34 = arith.constant 0 : index
    %c0_35 = arith.constant 0 : index
    %c0_36 = arith.constant 0 : index
    %c0_37 = arith.constant 0 : index
    %38 = vector.load %arg12[%c0_34, %c0_35, %c0_36, %c0_37] : memref<1x1x8x32xf32, #tpu.memory_space<vmem>>, vector<1x1x8x32xf32>
    %39 = vector.shape_cast %37 : vector<8x32xf32> to vector<1x1x8x32xf32>
    %40 = arith.addf %38, %39 : vector<1x1x8x32xf32>
    %c0_38 = arith.constant 0 : index
    %c0_39 = arith.constant 0 : index
    %c0_40 = arith.constant 0 : index
    %c0_41 = arith.constant 0 : index
    %41 = vector.load %arg12[%c0_38, %c0_39, %c0_40, %c0_41] : memref<1x1x8x32xf32, #tpu.memory_space<vmem>>, vector<1x1x8x32xf32>
    tpu.vector_store %arg12[%c0_38, %c0_39, %c0_40, %c0_41], %40 {strides = array<i32>} : memref<1x1x8x32xf32, #tpu.memory_space<vmem>>, vector<1x1x8x32xf32>,
    return
  }
  func.func @transform_0(%arg0: i32, %arg1: i32, %arg2: i32) -> (i32, i32, i32) {
    %c1_i32 = arith.constant 1 : i32
    %0 = arith.muli %arg0, %c1_i32 : i32
    %1 = arith.addi %0, %arg2 : i32
    %c0_i32 = arith.constant 0 : i32
    %c0_i32_0 = arith.constant 0 : i32
    return %arg1, %c0_i32, %1 : i32, i32, i32
  }
  func.func @transform_1(%arg0: i32, %arg1: i32, %arg2: i32) -> (i32, i32, i32) {
    %c1_i32 = arith.constant 1 : i32
    %0 = arith.muli %arg0, %c1_i32 : i32
    %1 = arith.addi %0, %arg2 : i32
    %c0_i32 = arith.constant 0 : i32
    %c0_i32_0 = arith.constant 0 : i32
    return %arg1, %1, %c0_i32 : i32, i32, i32
  }
  func.func @transform_2(%arg0: i32, %arg1: i32, %arg2: i32) -> (i32, i32, i32) {
    %c1_i32 = arith.constant 1 : i32
    %0 = arith.muli %arg0, %c1_i32 : i32
    %1 = arith.addi %0, %arg2 : i32
    %c0_i32 = arith.constant 0 : i32
    %c0_i32_0 = arith.constant 0 : i32
    return %arg1, %1, %c0_i32 : i32, i32, i32
  }
  func.func @transform_3(%arg0: i32, %arg1: i32, %arg2: i32) -> (i32, i32, i32) {
    %c1_i32 = arith.constant 1 : i32
    %0 = arith.muli %arg0, %c1_i32 : i32
    %1 = arith.addi %0, %arg2 : i32
    %c0_i32 = arith.constant 0 : i32
    %c0_i32_0 = arith.constant 0 : i32
    return %arg1, %1, %c0_i32 : i32, i32, i32
  }
  func.func @transform_4(%arg0: i32, %arg1: i32, %arg2: i32) -> (i32, i32, i32) {
    %c1_i32 = arith.constant 1 : i32
    %0 = arith.muli %arg0, %c1_i32 : i32
    %1 = arith.addi %0, %arg2 : i32
    %c0_i32 = arith.constant 0 : i32
    %c0_i32_0 = arith.constant 0 : i32
    return %arg1, %1, %c0_i32 : i32, i32, i32
  }
  func.func @transform_5(%arg0: i32, %arg1: i32, %arg2: i32) -> (i32, i32, i32) {
    %c1_i32 = arith.constant 1 : i32
    %0 = arith.muli %arg0, %c1_i32 : i32
    %1 = arith.addi %0, %arg2 : i32
    %c0_i32 = arith.constant 0 : i32
    %c0_i32_0 = arith.constant 0 : i32
    return %arg1, %1, %c0_i32 : i32, i32, i32
  }
  func.func @transform_6(%arg0: i32, %arg1: i32, %arg2: i32) -> (i32, i32, i32) {
    %c1_i32 = arith.constant 1 : i32
    %0 = arith.muli %arg0, %c1_i32 : i32
    %1 = arith.addi %0, %arg2 : i32
    %c0_i32 = arith.constant 0 : i32
    %c0_i32_0 = arith.constant 0 : i32
    return %arg1, %1, %c0_i32 : i32, i32, i32
  }
  func.func @transform_7(%arg0: i32, %arg1: i32, %arg2: i32) -> (i32, i32, i32) {
    %c1_i32 = arith.constant 1 : i32
    %0 = arith.muli %arg0, %c1_i32 : i32
    %1 = arith.addi %0, %arg2 : i32
    %c0_i32 = arith.constant 0 : i32
    %c0_i32_0 = arith.constant 0 : i32
    return %arg1, %1, %c0_i32 : i32, i32, i32
  }
  func.func @transform_8(%arg0: i32, %arg1: i32, %arg2: i32) -> (i32, i32, i32) {
    %c1_i32 = arith.constant 1 : i32
    %0 = arith.muli %arg0, %c1_i32 : i32
    %1 = arith.addi %0, %arg2 : i32
    %c0_i32 = arith.constant 0 : i32
    %c0_i32_0 = arith.constant 0 : i32
    return %arg1, %1, %c0_i32 : i32, i32, i32
  }
  func.func @transform_9(%arg0: i32, %arg1: i32, %arg2: i32) -> (i32, i32, i32, i32) {
    %c0_i32 = arith.constant 0 : i32
    %c0_i32_0 = arith.constant 0 : i32
    %c0_i32_1 = arith.constant 0 : i32
    return %arg0, %arg1, %c0_i32, %c0_i32_0 : i32, i32, i32, i32
  }
}

</mosaic_0001>

<bundles_post_ra>
// kernel: tpu_custom_call.1
= control target key start
LH: loop header
LB: loop body
LE: loop exit
PB: predicated region body
PF: predicated region fallthrough
CT: control target
= control target key end

     0   :  { %s2499_s0 = inlined_call_operand.hbm [shape: f32[2,1,8], index: 0, kind: input, shape index: {}]   ;;  %s2500_s1 = inlined_call_operand.hbm [shape: bf16[2,8,32], index: 1, kind: input, shape index: {}]   ;;  %s2501_s2 = inlined_call_operand.hbm [shape: bf16[2,8,32], index: 2, kind: input, shape index: {}]   ;;  %s2502_s3 = inlined_call_operand.hbm [shape: bf16[2,8,32], index: 3, kind: input, shape index: {}]   ;;  %s2503_s4 = inlined_call_operand.hbm [shape: bf16[2,8,32], index: 4, kind: input, shape index: {}]   ;;  %s2504_s5 = inlined_call_operand.vmem [shape: bf16[2,8,32], index: 5, kind: input, shape index: {}]   ;;  %s2505_s6 = inlined_call_operand.hbm [shape: bf16[2,8,32], index: 6, kind: input, shape index: {}]   ;;  %s2506_s7 = inlined_call_operand.hbm [shape: bf16[2,8,32], index: 7, kind: input, shape index: {}]   ;;  %s2507_s8 = inlined_call_operand.hbm [shape: bf16[2,8,32], index: 8, kind: input, shape index: {}]   ;;  %s2508_s9 = inlined_call_operand.hbm [shape: f32[1,2,8,32], index: 9, kind: output, shape index: {}]  }
   0x1   :  { %2520 = sst [smem:[#allocation30_spill]] %s2500_s1 }
   0x2   :  { %2521 = sst [smem:[#allocation31_spill]] %s2502_s3 }
   0x3   :  { %2522 = sst [smem:[#allocation32_spill]] %s2504_s5 }
   0x4   :  { %2523 = sst [smem:[#allocation33_spill]] %s2505_s6 }
   0x5   :  { %2524 = sst [smem:[#allocation34_spill]] %s2508_s9 }
   0x6   :  { %14 = vsyncpa [#allocation3], 0 }
   0x7   :  { %16 = vsyncpa [#allocation3 + $0x1], 0 }
   0x8   :  { %17 = vsyncpa [#allocation6], 0 }
   0x9   :  { %19 = vsyncpa [#allocation6 + $0x1], 0 }
   0xa   :  { %20 = vsyncpa [#allocation9], 0 }
   0xb   :  { %22 = vsyncpa [#allocation9 + $0x1], 0 }
   0xc   :  { %23 = vsyncpa [#allocation12], 0 }
   0xd   :  { %25 = vsyncpa [#allocation12 + $0x1], 0 }
   0xe   :  { %26 = vsyncpa [#allocation15], 0 }
   0xf   :  { %28 = vsyncpa [#allocation15 + $0x1], 0 }
  0x10   :  { %29 = vsyncpa [#allocation4], 0 }
  0x11   :  { %31 = vsyncpa [#allocation4 + $0x1], 0  ;;  %s2191_s30 = smov 0   ;;  %s2193_s10 = smov 0  }
  0x12   :  { %s2195_s11 = smov 0   ;;  %s2197_s12 = smov 0  }
  0x13   :  { %s2199_s13 = smov 0   ;;  %s2201_s14 = smov 0  }
  0x14 LB: > { %2525 = sst [smem:[#allocation23_spill]] %s2108_s30  ;;  %s2222_s15 = sadd.s32 4294967295, %s2128_s14   ;;  %s2128_s14 = sphi %s2201_s14, %s37_s14   ;;  %s2124_s13 = sphi %s2199_s13, %s2557_s13   ;;  %s2120_s12 = sphi %s2197_s12, %s2556_s12   ;;  %s2116_s11 = sphi %s2195_s11, %s2552_s11   ;;  %s2112_s10 = sphi %s2193_s10, %s2555_s10   ;;  %s2108_s30 = sphi %s2191_s30, %s2554_s30  }
  0x15   : > { %2526 = sst [smem:[#allocation24_spill]] %s2116_s11  ;;  %s1613_s16 = sadd.s32 4294967294, %s2128_s14  }
  0x16   : > { %2527 = sst [smem:[#allocation25_spill]] %s2128_s14  ;;  %s52_s17 = sadd.s32 1, %s2124_s13 }
  0x17   : > { %s67_s18 = sadd.s32 1, %s2116_s11  ;;  %p54_p0 = scmp.ge.s32.totalorder %s52_s17, 2 }
  0x18   : > { %p74_p1 = scmp.ne.s32.totalorder %s2116_s11, %s2112_s10  ;;  %p75_p2 = scmp.eq.s32.totalorder %s2128_s14, 0 }
  0x19   : > { %p80_p3 = scmp.ne.s32.totalorder %s2112_s10, %s2108_s30  ;;  %s2559_s17 = smov (%p54_p0, %s52_s17), 0 }
  0x1a   : > { %2528 = sst [smem:[#allocation26_spill]] %s2559_s17  ;;  %p2234_p4 = por %p75_p2, %p74_p1 }
  0x1b   : > { %p81_p5 = scmp.eq.s32.totalorder %s2222_s15, 0  ;;  %s62_s20 = ssub.s32 %s2124_s13, %s2559_s17 }
  0x1c   : > { %p346_p6 = scmp.eq.s32.totalorder %s2222_s15, 1  ;;  %p65_p7 = scmp.eq.s32.totalorder %s62_s20, 0 }
  0x1d   : > { %p2242_p8 = por %p81_p5, %p80_p3  ;;  %p352_p10 = scmp.eq.s32.totalorder %s1613_s16, 1 }
  0x1e   : > { %p2246_p9 = por %p346_p6, %p74_p1  ;;  %p1756_p13 = scmp.lt.s32.totalorder %s2128_s14, 2 }
  0x1f   : > { %s2251_s23 = scalar_select %p65_p7, %s2116_s11, %s67_s18  }
  0x20   : > { %s2531_s22 = scalar_select %p2246_p9, 1, 0 }
  0x21   : > { %2533 = sst [smem:[#allocation28_spill]] %s2251_s23  ;;  %p2253_p11 = por %p352_p10, %p80_p3 }
  0x22   : > { %2532 = sst [smem:[#allocation27_spill]] %s2531_s22  ;;  %s2260_s25 = sand.u32 1, %s2116_s11  }
  0x23   : > { %s2534_s24 = scalar_select %p2253_p11, 1, 0 }
  0x24   : > { %s2263_s26 = sand.u32 1, %s2128_s14   ;;  %s2266_s27 = sshll.u32 %s2260_s25, 2 }
  0x25   : > { %2535 = sst [smem:[#allocation29_spill]] %s2534_s24  ;;  %p2270_p0 = pnand %p1756_p13, %p2234_p4 }
  0x26   : > { %s2275_s29 = sshll.u32 %s2124_s13, 6  ;;  %s2537_s1 = sld [smem:[#allocation30_spill]] }
  0x27   : > { %s395_s17 = scalar_lea.vmem [#allocation5], %s2266_s27  ;;  %p1631_p1 = scmp.ge.s32.totalorder %s2128_s14, 1 }
  0x28   : > { %s404_s23 = sshll.u32 %s395_s17, 4  ;;  %p541_p2 = scmp.lt.s32.totalorder %s2128_s14, 3  ;;  %s405_s23 = int_to_ptr.vmem [resolvable:$true] %s404_s23 }
  0x29   : > { %s2516_s11 = scalar_lea.sflag [#allocation6], %s2263_s26  ;;  %p2287_p3 = pneg %p2270_p0 }
  0x2a   : > { %s1821_s24 = scalar_lea.vmem %s405_s23, 64  ;;  %s2130_s30 = smov [#allocation5]  }
  0x2b   : > { %p1822_p4 = scmp.ne.s32.totalorder %s405_s23, %s1821_s24  ;;  %s1826_s16 = sshll.u32 %s2130_s30, 4  ;;  %s1827_s16 = int_to_ptr.vmem [resolvable:$false] %s1826_s16 }
  0x2c   : > { %s402_s20 = scalar_lea.hbm %s2537_s1, %s2275_s29  ;;  %s1828_s18 = scalar_lea.vmem %s1827_s16, 128 }
  0x2d   : > { %p1824_p5 = pnand %p1822_p4, %p2287_p3  ;;  %p1829_p7 = scmp.lt.s32.totalorder %s405_s23, %s1827_s16 }
  0x2e   : > { %p1830_p10 = scmp.lt.s32.totalorder %s1828_s18, %s1821_s24 }
  0x2f   : > { %p1825_p6 = pneg %p1824_p5 }
  0x30   : > { %p1831_p13 = por %p1830_p10, %p1829_p7 }
  0x32   : > { %p1832_p12 = pnand %p1831_p13, %p1825_p6 }
  0x34   : > { %1835 = shalt.err (!%p1832_p12)
}
  0x35   : > { %1733 = dma.hbm_to_vmem [thread:$0]  (!%p2270_p0), %s402_s20, 64, %s405_s23, %s2516_s11  }
  0x36   : > { %p2301_p4 = pnand %p1631_p1, %p541_p2  ;;  %s2540_s3 = sld [smem:[#allocation31_spill]] }
  0x37   : > { %s435_s18 = scalar_lea.vmem [#allocation8], %s2266_s27  ;;  %s2519_s9 = scalar_lea.sflag [#allocation9], %s2263_s26 }
  0x38   : > { %s444_s1 = sshll.u32 %s435_s18, 4  ;;  %s2131_s23 = smov [#allocation8]   ;;  %s445_s1 = int_to_ptr.vmem [resolvable:$true] %s444_s1 }
  0x39   : > { %s1849_s22 = scalar_lea.vmem %s445_s1, 64  ;;  %s1854_s20 = sshll.u32 %s2131_s23, 4  ;;  %s1855_s20 = int_to_ptr.vmem [resolvable:$false] %s1854_s20 }
  0x3a   : > { %p1850_p12 = scmp.ne.s32.totalorder %s445_s1, %s1849_s22  ;;  %s1856_s11 = scalar_lea.vmem %s1855_s20, 128 }
  0x3b   : > { %p1857_p1 = scmp.lt.s32.totalorder %s445_s1, %s1855_s20  ;;  %p1858_p2 = scmp.lt.s32.totalorder %s1856_s11, %s1849_s22 }
  0x3c   : > { %s442_s16 = scalar_lea.hbm %s2540_s3, %s2275_s29  ;;  %p1852_p5 = pnand %p1850_p12, %p2287_p3 }
  0x3d   : > { %p1859_p7 = por %p1858_p2, %p1857_p1 }
  0x3e   : > { %p1853_p6 = pneg %p1852_p5 }
  0x40   : > { %p1860_p10 = pnand %p1859_p7, %p1853_p6 }
  0x42   : > { %1863 = shalt.err (!%p1860_p10)
}
  0x43   : > { %1739 = dma.hbm_to_vmem [thread:$0]  (!%p2270_p0), %s442_s16, 64, %s445_s1, %s2519_s9  }
  0x44   : > { %s2541_s6 = sld [smem:[#allocation33_spill]]  ;;  %s487_s23 = scalar_lea.vmem [#allocation11], %s2266_s27 }
  0x45   : > { %s496_s3 = sshll.u32 %s487_s23, 4  ;;  %s484_s11 = scalar_lea.sflag [#allocation12], %s2263_s26  ;;  %s497_s3 = int_to_ptr.vmem [resolvable:$true] %s496_s3 }
  0x46   : > { %s1877_s22 = scalar_lea.vmem %s497_s3, 64  ;;  %s2132_s20 = smov [#allocation11]  }
  0x47   : > { %p1878_p13 = scmp.ne.s32.totalorder %s497_s3, %s1877_s22  ;;  %s1882_s14 = sshll.u32 %s2132_s20, 4  ;;  %s1883_s14 = int_to_ptr.vmem [resolvable:$false] %s1882_s14 }
  0x48   : > { %s1884_s5 = scalar_lea.vmem %s1883_s14, 128  ;;  %p1885_p6 = scmp.lt.s32.totalorder %s497_s3, %s1883_s14 }
  0x49   : > { %p1880_p12 = pnand %p1878_p13, %p2287_p3  ;;  %p1886_p1 = scmp.lt.s32.totalorder %s1884_s5, %s1877_s22 }
  0x4a   : > { %s494_s18 = scalar_lea.hbm %s2541_s6, %s2275_s29 }
  0x4b   : > { %p1881_p5 = pneg %p1880_p12  ;;  %p1887_p2 = por %p1886_p1, %p1885_p6 }
  0x4d   : > { %p1888_p7 = pnand %p1887_p2, %p1881_p5 }
  0x4f   : > { %1891 = shalt.err (!%p1888_p7)
}
  0x50   : > { %1745 = dma.hbm_to_vmem [thread:$0]  (!%p2270_p0), %s494_s18, 64, %s497_s3, %s484_s11  }
  0x51   : > { %s1616_s1 = sshll.u32 %s2124_s13, 4  ;;  %s375_s23 = scalar_lea.vmem [#allocation2], %s2260_s25 }
  0x52   : > { %s382_s24 = scalar_lea.hbm %s2499_s0, %s1616_s1  ;;  %s384_s14 = sshll.u32 %s375_s23, 4  ;;  %s385_s14 = int_to_ptr.vmem [resolvable:$true] %s384_s14 }
  0x53   : > { %s373_s5 = scalar_lea.sflag [#allocation3], %s2260_s25  ;;  %s1905_s22 = scalar_lea.vmem %s385_s14, 16 }
  0x54   : > { %p1906_p10 = scmp.ne.s32.totalorder %s385_s14, %s1905_s22  ;;  %s2133_s20 = smov [#allocation2]  }
  0x55   : > { %s1910_s9 = sshll.u32 %s2133_s20, 4  ;;  %s1911_s9 = int_to_ptr.vmem [resolvable:$false] %s1910_s9 }
  0x56   : > { %p1908_p13 = pnand %p1906_p10, %p2287_p3  ;;  %s1912_s6 = scalar_lea.vmem %s1911_s9, 32 }
  0x57   : > { %p1913_p5 = scmp.lt.s32.totalorder %s385_s14, %s1911_s9  ;;  %p1914_p6 = scmp.lt.s32.totalorder %s1912_s6, %s1905_s22 }
  0x58   : > { %p1909_p12 = pneg %p1908_p13 }
  0x59   : > { %p1915_p1 = por %p1914_p6, %p1913_p5 }
  0x5b   : > { %p1916_p2 = pnand %p1915_p1, %p1909_p12 }
  0x5d   : > { %1919 = shalt.err (!%p1916_p2)
}
  0x5e   : > { %1730 = dma.hbm_to_vmem [thread:$0]  (!%p2270_p0), %s382_s24, 16, %s385_s14, %s373_s5  }
  0x5f   : > { %s422_s1 = scalar_lea.hbm %s2501_s2, %s2275_s29  ;;  %s415_s16 = scalar_lea.vmem [#allocation7], %s2266_s27 }
  0x60   : > { %s424_s17 = sshll.u32 %s415_s16, 4  ;;  %s2134_s6 = smov [#allocation7]   ;;  %s425_s17 = int_to_ptr.vmem [resolvable:$true] %s424_s17 }
  0x61   : > { %s1933_s23 = scalar_lea.vmem %s425_s17, 64  ;;  %s1938_s9 = sshll.u32 %s2134_s6, 4  ;;  %s1939_s9 = int_to_ptr.vmem [resolvable:$false] %s1938_s9 }
  0x62   : > { %p1934_p7 = scmp.ne.s32.totalorder %s425_s17, %s1933_s23  ;;  %s1940_s22 = scalar_lea.vmem %s1939_s9, 128 }
  0x63   : > { %p1941_p12 = scmp.lt.s32.totalorder %s425_s17, %s1939_s9  ;;  %p1942_p5 = scmp.lt.s32.totalorder %s1940_s22, %s1933_s23 }
  0x64   : > { %p1936_p10 = pnand %p1934_p7, %p2287_p3 }
  0x65   : > { %p1943_p6 = por %p1942_p5, %p1941_p12 }
  0x66   : > { %p1937_p13 = pneg %p1936_p10 }
  0x68   : > { %p1944_p1 = pnand %p1943_p6, %p1937_p13 }
  0x6a   : > { %1947 = shalt.err (!%p1944_p1)
}
  0x6b   : > { %s2542_s24 = scalar_lea.sflag [#allocation6], %s2263_s26  ;;  %s462_s20 = scalar_lea.hbm %s2503_s4, %s2275_s29 }
  0x6c   : > { %1736 = dma.hbm_to_vmem [thread:$0]  (!%p2270_p0), %s422_s1, 64, %s425_s17, %s2542_s24  }
  0x6d   : > { %s455_s3 = scalar_lea.vmem [#allocation10], %s2266_s27  ;;  %s2135_s23 = smov [#allocation10]  }
  0x6e   : > { %s464_s18 = sshll.u32 %s455_s3, 4  ;;  %s1966_s6 = sshll.u32 %s2135_s23, 4  ;;  %s465_s18 = int_to_ptr.vmem [resolvable:$true] %s464_s18  ;;  %s1967_s6 = int_to_ptr.vmem [resolvable:$false] %s1966_s6 }
  0x6f   : > { %s1961_s16 = scalar_lea.vmem %s465_s18, 64  ;;  %s1968_s9 = scalar_lea.vmem %s1967_s6, 128 }
  0x70   : > { %p1962_p2 = scmp.ne.s32.totalorder %s465_s18, %s1961_s16  ;;  %p1969_p13 = scmp.lt.s32.totalorder %s465_s18, %s1967_s6 }
  0x71   : > { %p1970_p12 = scmp.lt.s32.totalorder %s1968_s9, %s1961_s16 }
  0x72   : > { %p1964_p7 = pnand %p1962_p2, %p2287_p3 }
  0x73   : > { %p1971_p5 = por %p1970_p12, %p1969_p13 }
  0x74   : > { %p1965_p10 = pneg %p1964_p7 }
  0x76   : > { %p1972_p6 = pnand %p1971_p5, %p1965_p10 }
  0x78   : > { %1975 = shalt.err (!%p1972_p6)
}
  0x79   : > { %s2543_s1 = scalar_lea.sflag [#allocation9], %s2263_s26  ;;  %s514_s24 = scalar_lea.hbm %s2506_s7, %s2275_s29 }
  0x7a   : > { %1742 = dma.hbm_to_vmem [thread:$0]  (!%p2270_p0), %s462_s20, 64, %s465_s18, %s2543_s1  }
  0x7b   : > { %s507_s14 = scalar_lea.vmem [#allocation13], %s2266_s27  ;;  %s2136_s16 = smov [#allocation13]  }
  0x7c   : > { %s516_s5 = sshll.u32 %s507_s14, 4  ;;  %s1994_s23 = sshll.u32 %s2136_s16, 4  ;;  %s517_s5 = int_to_ptr.vmem [resolvable:$true] %s516_s5  ;;  %s1995_s23 = int_to_ptr.vmem [resolvable:$false] %s1994_s23 }
  0x7d   : > { %s1989_s3 = scalar_lea.vmem %s517_s5, 64  ;;  %s1996_s6 = scalar_lea.vmem %s1995_s23, 128 }
  0x7e   : > { %p1990_p1 = scmp.ne.s32.totalorder %s517_s5, %s1989_s3  ;;  %p1997_p10 = scmp.lt.s32.totalorder %s517_s5, %s1995_s23 }
  0x7f   : > { %p1998_p13 = scmp.lt.s32.totalorder %s1996_s6, %s1989_s3 }
  0x80   : > { %p1992_p2 = pnand %p1990_p1, %p2287_p3 }
  0x81   : > { %p1999_p12 = por %p1998_p13, %p1997_p10 }
  0x82   : > { %p1993_p7 = pneg %p1992_p2 }
  0x84   : > { %p2000_p5 = pnand %p1999_p12, %p1993_p7 }
  0x86   : > { %2003 = shalt.err (!%p2000_p5)
}
  0x87   : > { %1748 = dma.hbm_to_vmem [thread:$0]  (!%p2270_p0), %s514_s24, 64, %s517_s5, %s484_s11  }
  0x88   : > { %s534_s9 = scalar_lea.hbm %s2507_s8, %s2275_s29  ;;  %s527_s1 = scalar_lea.vmem [#allocation14], %s2266_s27 }
  0x89   : > { %s536_s17 = sshll.u32 %s527_s1, 4  ;;  %s524_s22 = scalar_lea.sflag [#allocation15], %s2260_s25  ;;  %s537_s17 = int_to_ptr.vmem [resolvable:$true] %s536_s17 }
  0x8a   : > { %s2017_s14 = scalar_lea.vmem %s537_s17, 64  ;;  %s2137_s3 = smov [#allocation14]  }
  0x8b   : > { %p2018_p6 = scmp.ne.s32.totalorder %s537_s17, %s2017_s14  ;;  %s2022_s26 = sshll.u32 %s2137_s3, 4  ;;  %s2023_s26 = int_to_ptr.vmem [resolvable:$false] %s2022_s26 }
  0x8c   : > { %s2024_s16 = scalar_lea.vmem %s2023_s26, 128  ;;  %p2025_p7 = scmp.lt.s32.totalorder %s537_s17, %s2023_s26 }
  0x8d   : > { %p2020_p1 = pnand %p2018_p6, %p2287_p3  ;;  %p2026_p10 = scmp.lt.s32.totalorder %s2024_s16, %s2017_s14 }
  0x8f   : > { %p2021_p2 = pneg %p2020_p1  ;;  %p2027_p13 = por %p2026_p10, %p2025_p7 }
  0x91   : > { %p2028_p12 = pnand %p2027_p13, %p2021_p2 }
  0x93   : > { %2031 = shalt.err (!%p2028_p12)
}
  0x94   : > { %1751 = dma.hbm_to_vmem [thread:$0]  (!%p2270_p0), %s534_s9, 64, %s537_s17, %s524_s22  }
  0x95   : > { %545 = sbr.rel (%p2301_p4) target bundleno = 395 (0x18b), region = 56  ;;  %s2385_s25 = sand.u32 (!%p2301_p4), 1, %s2112_s10  }
  0x96   : > { %s548_s27 = scalar_lea.sflag (!%p2301_p4), [#allocation3], %s2385_s25  ;;  %s550_s29 = scalar_lea.vmem (!%p2301_p4), [#allocation2], %s2385_s25 }
  0x9a   : > { %2083 = dma.done.wait (%p2242_p8), %s548_s27, 16  }
  0x9b   : > { %2085 = vsyncadd (%p2242_p8), %s548_s27, 4294967280  ;;  %s555_s28 = sand.u32 1, %s2222_s15   ;;  %s2395_s19 = sshll.u32 %s2385_s25, 2 }
  0x9c   : > { %s556_s30 = scalar_lea.sflag [#allocation6], %s555_s28  ;;  %s559_s11 = scalar_lea.vmem [#allocation5], %s2395_s19 }
  0x9d   : > { %2087 = dma.done.wait (%p2242_p8), %s556_s30, 128  }
  0x9e   : > { %2089 = vsyncadd (%p2242_p8), %s556_s30, 4294967168  ;;  %s568_s24 = scalar_lea.vmem [#allocation7], %s2395_s19  ;;  %s574_s5 = scalar_lea.sflag [#allocation9], %s555_s28 }
  0x9f   : > { %s577_s23 = scalar_lea.vmem [#allocation8], %s2395_s19 }
  0xa0   : > { %2091 = dma.done.wait (%p2242_p8), %s574_s5, 128  }
  0xa1   : > { %2093 = vsyncadd (%p2242_p8), %s574_s5, 4294967168  ;;  %s586_s15 = scalar_lea.vmem [#allocation10], %s2395_s19  ;;  %s592_s6 = scalar_lea.sflag [#allocation12], %s555_s28 }
  0xa2   : > { %s595_s20 = scalar_lea.vmem [#allocation11], %s2395_s19 }
  0xa3   : > { %2095 = dma.done.wait (%p2242_p8), %s592_s6, 128  }
  0xa4   : > { %2097 = vsyncadd (%p2242_p8), %s592_s6, 4294967168  ;;  %s604_s18 = scalar_lea.vmem [#allocation13], %s2395_s19  ;;  %s610_s9 = scalar_lea.sflag [#allocation15], %s2385_s25 }
  0xa5   : > { %s613_s1 = scalar_lea.vmem [#allocation14], %s2395_s19 }
  0xa6   : > { %2099 = dma.done.wait (%p2242_p8), %s610_s9, 64  }
  0xa7   : > { %2101 = vsyncadd (%p2242_p8), %s610_s9, 4294967232  ;;  %p696_p0 = scmp.lt.s32.totalorder %s2120_s12, 1  ;;  %v2138_v0 = vmov 0.0   ;;  %vm2139_vm0 = vmmov 0   ;;  %v714_v1 = vld [vmem:[%s559_s11] sm:$0xf] }
  0xa8   : > { %1669 = vmatprep.subr.mxu0 %v2138_v0  ;;  %1674 = vmatprep.subr.mxu1 %v2138_v0  ;;  %v790_v2 = vld [vmem:[%s568_s24] sm:$0xf]  ;;  %vm716_vm1 = vcmask 64512   ;;  %s2544_s3 = sld [smem:[#allocation32_spill]]  ;;  %v715_v3 = vunpack.c.l.bf16 %v714_v1  ;;  %v713_v5 = vld [vmem:[%s550_s29] sm:$0x1] }
  0xa9   : > { %1671 = vmatprep.mubr.msk.f32.mxu0 %vm2139_vm0, %v2138_v0  ;;  %1676 = vmatprep.mubr.msk.f32.mxu1 %vm2139_vm0, %v2138_v0  ;;  %s697_s17 = scalar_select %p696_p0, %s2120_s12, 1  ;;  %v791_v4 = vunpack.c.l.bf16 %v790_v2  ;;  %v862_v6 = vld [vmem:[%s577_s23] sm:$0xf]  ;;  %v934_v7 = vld [vmem:[%s586_s15] sm:$0xf]  ;;  %vm711_vm2 = vcmask 261120  }
  0xaa   : > { %v863_v8 = vunpack.c.l.bf16 %v862_v6  ;;  %v935_v9 = vunpack.c.l.bf16 %v934_v7  ;;  %1670 = vmatpush3.msra.mxu0 %v715_v3  ;;  %v1078_v11 = vld [vmem:[%s595_s20] sm:$0xf]  ;;  %v1150_v14 = vld [vmem:[%s604_s18] sm:$0xf]  ;;  %v1222_v15 = vld [vmem:[%s613_s1] sm:$0xf] }
  0xab   : > { %s1640_s22 = sshll.u32 %s697_s17, 2  ;;  %1675 = vmatpush3.msra.mxu1 %v791_v4  ;;  %1672 = vmatmul.mubr.msk.f32.vlgmr.msra.gmra.mxu0 %vm716_vm1, %v713_v5  ;;  %v1079_v13 = vunpack.c.l.bf16 %v1078_v11  ;;  %v1151_v16 = vunpack.c.l.bf16 %v1150_v14  ;;  %v1223_v17 = vunpack.c.l.bf16 %v1222_v15  ;;  %s1639_s16 = sshll.u32 %s2385_s25, 3  ;;  %vm1315_vm3 = vcmask 1040384  }
  0xac   : > { %1677 = vmatmul.mubr.msk.f32.vlgmr.msra.gmra.mxu1 %vm716_vm1, %v713_v5  ;;  %1679 = vmatprep.subr.mxu0 %v2138_v0  ;;  %s2451_s27 = scalar_lea.vmem [#allocation16], %s1639_s16  ;;  %vm1317_vm4 = vcmask 1041408   ;;  %vm1319_vm5 = vcmask 1042432   ;;  %vm1321_vm6 = vcmask 1043456   ;;  %vm1323_vm7 = vcmask 1044480   ;;  %s1650_s28 = sshll.u32 %s2120_s12, 7 }
  0xad   : > { %1684 = vmatprep.subr.mxu1 %v2138_v0  ;;  %1680 = vmatpush3.msra.mxu0 %v863_v8  ;;  %712 = vst.msk [vmem:[%s2451_s27] sm:$0xff] %vm711_vm2, %v2138_v0  ;;  %vm1325_vm8 = vcmask 1045504   ;;  %vm1327_vm9 = vcmask 1046528   ;;  %s1349_s19 = sshll.u32 %s2451_s27, 4  ;;  %s2546_s24 = sld [smem:[#allocation34_spill]]  ;;  %s1350_s19 = int_to_ptr.vmem [resolvable:$true] %s1349_s19 }
  0xae   : > { %s702_s26 = scalar_lea.vmem %s2544_s3, %s1640_s22  ;;  %1685 = vmatpush3.msra.mxu1 %v935_v9  ;;  %1681 = vmatprep.mubr.msk.f32.mxu0 %vm2139_vm0, %v2138_v0  ;;  %s1334_s23 = scalar_lea.sflag [#allocation4], %s2385_s25 }
  0xaf   : > { %v1006_v10 = vld [vmem:[%s702_s26] sm:$0xf]  ;;  %1686 = vmatprep.mubr.msk.f32.mxu1 %vm2139_vm0, %v2138_v0  ;;  %1682 = vmatmul.mubr.msk.f32.vlgmr.msra.gmra.mxu0 %vm716_vm1, %v713_v5  ;;  %s2032_s15 = scalar_lea.vmem %s1350_s19, 128  ;;  %s2140_s6 = smov [#allocation16]  }
  0xb0   : > { %v1007_v12 = vunpack.c.l.bf16 %v1006_v10  ;;  %1687 = vmatmul.mubr.msk.f32.vlgmr.msra.gmra.mxu1 %vm716_vm1, %v713_v5  ;;  %1689 = vmatprep.subr.mxu0 %v2138_v0  ;;  %p2033_p8 = scmp.ne.s32.totalorder %s1350_s19, %s2032_s15  ;;  %s2036_s20 = sshll.u32 %s2140_s6, 4  ;;  %s2037_s20 = int_to_ptr.vmem [resolvable:$false] %s2036_s20 }
  0xb1   : > { %1694 = vmatprep.subr.mxu1 %v2138_v0  ;;  %1691 = vmatprep.mubr.msk.f32.mxu0 %vm2139_vm0, %v2138_v0  ;;  %s2038_s12 = scalar_lea.vmem %s2037_s20, 256  ;;  %p2039_p5 = scmp.lt.s32.totalorder %s1350_s19, %s2037_s20 }
  0xb2   : > { %1690 = vmatpush3.msra.mxu0 %v1007_v12  ;;  %1695 = vmatpush3.msra.mxu1 %v1079_v13  ;;  %p2034_p3 = pnand %p2033_p8, %p2246_p9  ;;  %p2040_p6 = scmp.lt.s32.totalorder %s2038_s12, %s2032_s15 }
  0xb3   : > { %1696 = vmatprep.mubr.msk.f32.mxu1 %vm2139_vm0, %v2138_v0  ;;  %1692 = vmatmul.mubr.msk.f32.vlgmr.msra.gmra.mxu0 %vm716_vm1, %v713_v5  ;;  %s1347_s5 = scalar_lea.hbm %s2546_s24, %s1650_s28 }
  0xb4   : > { %1697 = vmatmul.mubr.msk.f32.vlgmr.msra.gmra.mxu1 %vm716_vm1, %v713_v5  ;;  %1699 = vmatprep.subr.mxu0 %v2138_v0  ;;  %v1329_v44 = vld [vmem:[%s2451_s27] sm:$0xff]  ;;  %p2035_p4 = pneg %p2034_p3  ;;  %p2041_p1 = por %p2040_p6, %p2039_p5 }
  0xb5   : > { %1704 = vmatprep.subr.mxu1 %v2138_v0  ;;  %1700 = vmatpush3.msra.mxu0 %v1151_v16 }
  0xb6   : > { %1705 = vmatpush3.msra.mxu1 %v1223_v17  ;;  %1701 = vmatprep.mubr.msk.f32.mxu0 %vm2139_vm0, %v2138_v0  ;;  %p2042_p2 = pnand %p2041_p1, %p2035_p4 }
  0xb7   : > { %1706 = vmatprep.mubr.msk.f32.mxu1 %vm2139_vm0, %v2138_v0  ;;  %1702 = vmatmul.mubr.msk.f32.vlgmr.msra.gmra.mxu0 %vm716_vm1, %v713_v5 }
  0xb8   : > { %1707 = vmatmul.mubr.msk.f32.vlgmr.msra.gmra.mxu1 %vm716_vm1, %v713_v5 }
 0x16b   : > { %v786_v18 = vpop.f32.mrf.mxu0 }
 0x16c   : > { %v858_v19 = vpop.f32.mrf.mxu1 }
 0x16d   : > { %v1295_v20 = vrot.slane %v858_v19, 7  ;;  %v1673_v21 = vpop.f32.mrf.mxu0 }
 0x16e   : > { %v1678_v22 = vpop.f32.mrf.mxu1 }
 0x16f   : > { %v930_v23 = vpop.f32.mrf.mxu0  ;;  %v1316_v26 = vsel %vm1315_vm3, %v786_v18, %v1295_v20 }
 0x170   : > { %v1002_v24 = vpop.f32.mrf.mxu1  ;;  %v1298_v25 = vrot.slane %v930_v23, 6 }
 0x171   : > { %v1301_v27 = vrot.slane %v1002_v24, 5  ;;  %v1683_v28 = vpop.f32.mrf.mxu0 }
 0x172   : > { %v1688_v29 = vpop.f32.mrf.mxu1  ;;  %v1318_v30 = vsel %vm1317_vm4, %v1316_v26, %v1298_v25 }
 0x173   : > { %v1074_v31 = vpop.f32.mrf.mxu0  ;;  %v1320_v34 = vsel %vm1319_vm5, %v1318_v30, %v1301_v27 }
 0x174   : > { %v1146_v32 = vpop.f32.mrf.mxu1  ;;  %v1304_v33 = vrot.slane %v1074_v31, 4 }
 0x175   : > { %v1307_v35 = vrot.slane %v1146_v32, 3  ;;  %v1693_v36 = vpop.f32.mrf.mxu0 }
 0x176   : > { %v1698_v37 = vpop.f32.mrf.mxu1  ;;  %v1322_v38 = vsel %vm1321_vm6, %v1320_v34, %v1304_v33 }
 0x177   : > { %v1218_v39 = vpop.f32.mrf.mxu0  ;;  %v1324_v43 = vsel %vm1323_vm7, %v1322_v38, %v1307_v35 }
 0x178   : > { %v1290_v40 = vpop.f32.mrf.mxu1  ;;  %v1310_v41 = vrot.slane %v1218_v39, 2 }
 0x179   : > { %v1313_v42 = vrot.slane %v1290_v40, 1  ;;  %v1703_v45 = vpop.f32.mrf.mxu0 }
 0x17a   : > { %v1708_v46 = vpop.f32.mrf.mxu1  ;;  %v1326_v47 = vsel %vm1325_vm8, %v1324_v43, %v1310_v41 }
 0x17b   : > { %v1328_v48 = vsel %vm1327_vm9, %v1326_v47, %v1313_v42 }
 0x17c   : > { %v1330_v49 = vadd.f32 %v1329_v44, %v1328_v48 }
 0x17e   : > { %1332 = vst.msk [vmem:[%s2451_s27] sm:$0xff] %vm711_vm2, %v1330_v49 }
 0x17f   : > { %2045 = shalt.err (!%p2042_p2)
}
 0x180   : > { %s2046_s18 = scalar_lea.hbm %s1347_s5, 128  ;;  %s2050_s1 = scalar_lea.hbm %s2546_s24, 256 }
 0x181   : > { %p2047_p7 = scmp.ne.s32.totalorder %s1347_s5, %s2046_s18  ;;  %p2051_p12 = scmp.lt.s32.totalorder %s1347_s5, %s2546_s24 }
 0x182   : > { %p2052_p0 = scmp.lt.s32.totalorder %s2050_s1, %s2046_s18 }
 0x183   : > { %p2048_p10 = pnand %p2047_p7, %p2246_p9 }
 0x184   : > { %p2053_p8 = por %p2052_p0, %p2051_p12 }
 0x185   : > { %p2049_p13 = pneg %p2048_p10 }
 0x187   : > { %p2054_p3 = pnand %p2053_p8, %p2049_p13 }
 0x189   : > { %2057 = shalt.err (!%p2054_p3)
}
 0x18a   : > { %1725 = dma.vmem_to_hbm [thread:$0]  (%p2246_p9), %s1350_s19, 128, %s1347_s5, %s1334_s23  }
 0x18b PF: > { %s2547_s21 = sld [smem:[#allocation23_spill]] }
 0x18c   : > { %s2549_s3 = sld [smem:[#allocation25_spill]] }
 0x191   : > { %s1361_s26 = sand.u32 1, %s2547_s21  }
 0x192   : > { %p2550_p4 = scmp.ge.s32.totalorder %s2549_s3, 2  ;;  %s1362_s16 = scalar_lea.sflag [#allocation4], %s1361_s26 }
 0x194   : > { %p1753_p5 = pnand %p2550_p4, %p2253_p11 }
 0x196   : > { %p1754_p6 = pneg %p1753_p5 }
 0x198   : > { %2103 = dma.done.wait (%p1754_p6), %s1362_s16, 128  }
 0x199   : > { %2105 = vsyncadd (%p1754_p6), %s1362_s16, 4294967168  ;;  %s37_s14 = sadd.s32 1, %s2549_s3   ;;  %s2551_s27 = sld [smem:[#allocation24_spill]] }
 0x19a   : > { %p34_p1 = scmp.ge.s32.totalorder %s37_s14, 4   ;;  %s2552_s11 = sld [smem:[#allocation28_spill]] }
 0x19b   : > { %s2553_s29 = sld [smem:[#allocation26_spill]]  ;;  %s2554_s30 = smov %s2112_s10 }
 0x19c   : > { %s2556_s12 = smov %s2124_s13 }
 0x19d   :  { %36 = sbr.rel (!%p34_p1) target bundleno = 20 (0x14), region = 193 }
 0x19f   : > { %s2555_s10 = smov %s2551_s27 }
 0x1a1   : > { %s2557_s13 = smov %s2553_s29 }
 0x1a2   :  { %1367 = vsyncpa [#allocation3], 1 }
 0x1a3   :  { %1369 = vsyncpa [#allocation3 + $0x1], 1 }
 0x1a4   :  { %1370 = vsyncpa [#allocation6], 1 }
 0x1a5   :  { %1372 = vsyncpa [#allocation6 + $0x1], 1 }
 0x1a6   :  { %1373 = vsyncpa [#allocation9], 1 }
 0x1a7   :  { %1375 = vsyncpa [#allocation9 + $0x1], 1 }
 0x1a8   :  { %1376 = vsyncpa [#allocation12], 1 }
 0x1a9   :  { %1378 = vsyncpa [#allocation12 + $0x1], 1 }
 0x1aa   :  { %1379 = vsyncpa [#allocation15], 1 }
 0x1ab   :  { %1381 = vsyncpa [#allocation15 + $0x1], 1 }
 0x1ac   :  { %1382 = vsyncpa [#allocation4], 1 }
 0x1ad   :  { %1384 = vsyncpa [#allocation4 + $0x1], 1 }

</bundles_post_ra>
